<compile_context>
chip_gen: v5e
topology: v5e:2x2
jax: 0.10.0
libtpu: 0.0.40
codegen_flags: <defaults>
</compile_context>

<pallas_src>
import numpy as np
import jax
import jax.numpy as jnp
from jax.experimental import pallas as pl
from jax.experimental.pallas import tpu as pltpu


def _round_up(x, m):
    return (x + m - 1) // m * m


def _cdiv(a, b):
    return -(-a // b)


def _make_controller_mlp_kernel(num_layers, mxu_dtype, approx_softmax):
    """Kernel refs: x_tile, (w_folded, shift) * num_layers, out_tile."""
    def kernel(*refs):
        x_ref = refs[0]
        o_ref = refs[-1]
        h = x_ref[...]
        if h.dtype != mxu_dtype:
            h = h.astype(mxu_dtype)          # in-kernel cast: no extra HBM pass
        act = None
        idx = 1
        for _ in range(num_layers):
            w_ref, s_ref = refs[idx], refs[idx + 1]
            idx += 2
            # Linear with folded BN scale (MXU); bias + BN shift folded into s_ref.
            act = jnp.dot(h, w_ref[...], preferred_element_type=jnp.float32)
            act = jnp.maximum(act + s_ref[...], 0.0)      # f32 elementwise (VPU)
            h = act.astype(w_ref.dtype)                   # next dot in MXU dtype
        # softmax over dim=1 (feature axis), f32.
        m = jnp.max(act, axis=-1, keepdims=True)
        e = jnp.exp(act - m)
        s = jnp.sum(e, axis=-1, keepdims=True)
        if approx_softmax:
            out = e * pl.reciprocal(s, approx=True)       # EUP slot (bf16 path)
        else:
            out = e / s                                   # exact (f32 path, 1e-5)
        o_ref[...] = out.astype(o_ref.dtype)
    return kernel


def controller_mlp_forward(emb_fields, params, *, mxu_dtype=jnp.float32,
                           block_batch=8192, tile_vmem_budget=20 << 20):
    """emb_fields: (B, F, E). params: list of per-layer dicts (see init_params)."""
    mxu_dtype = np.dtype(mxu_dtype)
    B = emb_fields.shape[0]
    x = emb_fields.reshape(B, -1)            # flatten(start_dim=1); no copy
    d_in = x.shape[1]
    in_bytes = x.dtype.itemsize
    mxu_bytes = mxu_dtype.itemsize

    # Fold bias + eval-mode BatchNorm into the weights / a single shift.
    eps = 1e-5
    folded, dims = [], []
    for p in params:
        scale = p["gamma"] / jnp.sqrt(p["running_var"] + eps)
        shift = p["beta"] - p["running_mean"] * scale
        w_f = (p["w"] * scale[None, :]).astype(mxu_dtype)            # (in, out)
        s_f = (p["b"] * scale + shift).astype(jnp.float32)[None, :]  # (1, out)
        folded.append((w_f, s_f))
        dims.append(int(w_f.shape[1]))
    out_dim = dims[-1]
    weights_bytes = sum(int(w.size) * w.dtype.itemsize + int(s.size) * 4
                        for w, s in folded)

    # --- Batch tile: largest that fits a conservative double-buffered VMEM budget.
    row_bytes = (2 * d_in * in_bytes          # x tile, double-buffered
                 + d_in * mxu_bytes           # in-kernel cast copy
                 + 2 * out_dim * 4            # out tile, double-buffered
                 + 4 * sum(dims))             # f32 intermediates (spill bound)
    tb_vmem = max(8, (tile_vmem_budget // row_bytes) // 8 * 8)
    TB = max(8, min(int(block_batch), tb_vmem, _round_up(B, 8)) // 8 * 8)
    # v7x megacore: avoid odd grids > 1 (2 TCs -> 2:1 imbalance, ~33% lost).
    steps = _cdiv(B, TB)
    if steps > 1 and steps % 2 == 1:
        tb2 = max(8, _round_up(_cdiv(B, steps + 1), 8))
        if _cdiv(B, tb2) % 2 == 0:
            TB = tb2
    grid = (_cdiv(B, TB),)   # ragged last block: no host pad, no trailing slice

    vmem_limit = int(min(max(TB * row_bytes + 2 * weights_bytes + (4 << 20),
                             32 << 20), 48 << 20))

    flat_args = [x]
    in_specs = [pl.BlockSpec((TB, d_in), lambda i: (i, 0))]
    for w_f, s_f in folded:
        flat_args += [w_f, s_f]
        # Weights / shifts: full block, constant index -> VMEM-resident across grid.
        in_specs += [pl.BlockSpec(w_f.shape, lambda i: (0, 0)),
                     pl.BlockSpec(s_f.shape, lambda i: (0, 0))]

    flops = 2 * B * sum(a * b for a, b in zip([d_in] + dims[:-1], dims))
    cost = pl.CostEstimate(
        flops=flops,
        transcendentals=B * out_dim,
        bytes_accessed=B * d_in * in_bytes + B * out_dim * 4 + weights_bytes)

    kernel = _make_controller_mlp_kernel(
        len(folded), mxu_dtype, approx_softmax=(mxu_dtype != np.dtype(np.float32)))
    return pl.pallas_call(
        kernel,
        grid=grid,
        in_specs=in_specs,
        out_specs=pl.BlockSpec((TB, out_dim), lambda i: (i, 0)),
        out_shape=jax.ShapeDtypeStruct((B, out_dim), jnp.float32),
        compiler_params=pltpu.CompilerParams(
            dimension_semantics=("parallel",),
            vmem_limit_bytes=vmem_limit),
        cost_estimate=cost,
    )(*flat_args)


def init_params(key, input_dim, embed_dims):
    """Xavier-normal weights, zero bias (matches weight_init); BN at defaults."""
    params = []
    d_in = input_dim
    for d_out in embed_dims:
        key, sub = jax.random.split(key)
        std = (2.0 / (d_in + d_out)) ** 0.5  # xavier_normal_ gain=1
        w = std * jax.random.normal(sub, (d_in, d_out), dtype=jnp.float32)
        params.append(dict(
            w=w,
            b=jnp.zeros((d_out,), jnp.float32),
            gamma=jnp.ones((d_out,), jnp.float32),
            beta=jnp.zeros((d_out,), jnp.float32),
            running_mean=jnp.zeros((d_out,), jnp.float32),
            running_var=jnp.ones((d_out,), jnp.float32),
        ))
        d_in = d_out
    return params


def _reference(emb_fields, params):
    B = emb_fields.shape[0]
    h = emb_fields.reshape(B, -1).astype(jnp.float32)
    eps = 1e-5
    for p in params:
        h = h @ p["w"] + p["b"]
        h = (h - p["running_mean"]) / jnp.sqrt(p["running_var"] + eps)
        h = h * p["gamma"] + p["beta"]
        h = jnp.maximum(h, 0.0)
    return jax.nn.softmax(h, axis=1)


if __name__ == "__main__":
    key = jax.random.PRNGKey(0)
    B, F, E = 2, 4, 8                 # emb_fields: (batch, num_fields, embed_dim)
    input_dim = F * E                 # = 32 after flatten
    embed_dims = [32, 16]

    k_x, k_p, k_x2 = jax.random.split(key, 3)
    emb_fields = jax.random.normal(k_x, (B, F, E), dtype=jnp.float32)
    params = init_params(k_p, input_dim, embed_dims)

    # --- f32 path (exact), tiny batch (single ragged block, B < tile) ---
    out = jax.block_until_ready(controller_mlp_forward(emb_fields, params))
    ref = _reference(emb_fields, params)
    assert out.shape == (B, embed_dims[-1])
    assert jnp.allclose(out, ref, atol=1e-5, rtol=1e-5)
    assert jnp.allclose(jnp.sum(out, axis=1), 1.0, atol=1e-5)

    # --- f32 path, larger batch, small forced tile: multi-step even grid +
    #     ragged last block, no host-side pad / slice ---
    B2 = 300
    emb_fields2 = jax.random.normal(k_x2, (B2, F, E), dtype=jnp.float32)
    out2 = jax.block_until_ready(
        controller_mlp_forward(emb_fields2, params, block_batch=128))
    ref2 = _reference(emb_fields2, params)
    assert out2.shape == (B2, embed_dims[-1])
    assert jnp.allclose(out2, ref2, atol=1e-5, rtol=1e-5)

    # --- f32 path, default (large) tile: single-step grid ---
    out3 = jax.block_until_ready(controller_mlp_forward(emb_fields2, params))
    assert jnp.allclose(out3, ref2, atol=1e-5, rtol=1e-5)

    # --- bf16 MXU path (valid on v5e/v6e/v7x): in-kernel cast, f32 elementwise ---
    out_bf16 = jax.block_until_ready(
        controller_mlp_forward(emb_fields2, params, mxu_dtype=jnp.bfloat16,
                               block_batch=128))
    assert out_bf16.shape == (B2, embed_dims[-1])
    assert bool(jnp.all(jnp.isfinite(out_bf16)))
    assert jnp.allclose(jnp.sum(out_bf16, axis=1), 1.0, atol=2e-2)
    assert jnp.allclose(out_bf16, ref2, atol=5e-2)

    print("KERNEL_OK")
</pallas_src>

<mosaic_0001>
module attributes {stable_mosaic.version = 11 : i64} {
  func.func @kernel(%arg0: i32, %arg1: memref<8x32xf32, #tpu.memory_space<vmem>>, %arg2: memref<32x32xf32, #tpu.memory_space<vmem>>, %arg3: memref<1x32xf32, #tpu.memory_space<vmem>>, %arg4: memref<32x16xf32, #tpu.memory_space<vmem>>, %arg5: memref<1x16xf32, #tpu.memory_space<vmem>>, %arg6: memref<8x16xf32, #tpu.memory_space<vmem>>) attributes {dimension_semantics = [#tpu.dimension_semantics<parallel>], iteration_bounds = array<i64: 1>, scalar_prefetch = 0 : i64, scratch_operands = 0 : i64, tpu.core_type = #tpu.core_type<tc>, window_params = [{transform_indices = @transform_0, window_bounds = array<i64: 8, 32>}, {pipeline_mode = #tpu.pipeline_mode<synchronous>, transform_indices = @transform_1, window_bounds = array<i64: 32, 32>}, {pipeline_mode = #tpu.pipeline_mode<synchronous>, transform_indices = @transform_2, window_bounds = array<i64: 1, 32>}, {pipeline_mode = #tpu.pipeline_mode<synchronous>, transform_indices = @transform_3, window_bounds = array<i64: 32, 16>}, {pipeline_mode = #tpu.pipeline_mode<synchronous>, transform_indices = @transform_4, window_bounds = array<i64: 1, 16>}, {transform_indices = @transform_5, window_bounds = array<i64: 8, 16>}]} {
    %c0 = arith.constant 0 : index
    %c0_0 = arith.constant 0 : index
    %0 = vector.load %arg1[%c0, %c0_0] : memref<8x32xf32, #tpu.memory_space<vmem>>, vector<8x32xf32>
    %c0_1 = arith.constant 0 : index
    %c0_2 = arith.constant 0 : index
    %1 = vector.load %arg2[%c0_1, %c0_2] : memref<32x32xf32, #tpu.memory_space<vmem>>, vector<32x32xf32>
    %cst = arith.constant dense<0.000000e+00> : vector<8x32xf32>
    %2 = tpu.matmul %0, %1, %cst {dimension_numbers = #tpu.dot_dimension_numbers<[1], [0], [0], [1], [0, 0, 1, 1], [], []>} : vector<8x32xf32>, vector<32x32xf32>, vector<8x32xf32> -> vector<8x32xf32>
    %c0_3 = arith.constant 0 : index
    %c0_4 = arith.constant 0 : index
    %3 = vector.load %arg3[%c0_3, %c0_4] : memref<1x32xf32, #tpu.memory_space<vmem>>, vector<1x32xf32>
    %4 = vector.broadcast %3 : vector<1x32xf32> to vector<8x32xf32>
    %5 = arith.addf %2, %4 : vector<8x32xf32>
    %cst_5 = arith.constant 0.000000e+00 : f32
    %6 = vector.broadcast %cst_5 : f32 to vector<8x32xf32>
    %7 = arith.maximumf %5, %6 : vector<8x32xf32>
    %c0_6 = arith.constant 0 : index
    %c0_7 = arith.constant 0 : index
    %8 = vector.load %arg4[%c0_6, %c0_7] : memref<32x16xf32, #tpu.memory_space<vmem>>, vector<32x16xf32>
    %cst_8 = arith.constant dense<0.000000e+00> : vector<8x16xf32>
    %9 = tpu.matmul %7, %8, %cst_8 {dimension_numbers = #tpu.dot_dimension_numbers<[1], [0], [0], [1], [0, 0, 1, 1], [], []>} : vector<8x32xf32>, vector<32x16xf32>, vector<8x16xf32> -> vector<8x16xf32>
    %c0_9 = arith.constant 0 : index
    %c0_10 = arith.constant 0 : index
    %10 = vector.load %arg5[%c0_9, %c0_10] : memref<1x16xf32, #tpu.memory_space<vmem>>, vector<1x16xf32>
    %11 = vector.broadcast %10 : vector<1x16xf32> to vector<8x16xf32>
    %12 = arith.addf %9, %11 : vector<8x16xf32>
    %cst_11 = arith.constant 0.000000e+00 : f32
    %13 = vector.broadcast %cst_11 : f32 to vector<8x16xf32>
    %14 = arith.maximumf %12, %13 : vector<8x16xf32>
    %cst_12 = arith.constant dense<0xFF800000> : vector<8xf32>
    %15 = vector.multi_reduction <maximumf>, %14, %cst_12 [1] : vector<8x16xf32> to vector<8xf32>
    %16 = vector.shape_cast %15 : vector<8xf32> to vector<8x1xf32>
    %17 = vector.broadcast %16 : vector<8x1xf32> to vector<8x16xf32>
    %18 = arith.subf %14, %17 : vector<8x16xf32>
    %19 = math.exp %18 : vector<8x16xf32>
    %cst_13 = arith.constant dense<0.000000e+00> : vector<8xf32>
    %20 = vector.multi_reduction <add>, %19, %cst_13 [1] : vector<8x16xf32> to vector<8xf32>
    %21 = vector.shape_cast %20 : vector<8xf32> to vector<8x1xf32>
    %22 = vector.broadcast %21 : vector<8x1xf32> to vector<8x16xf32>
    %23 = arith.divf %19, %22 : vector<8x16xf32>
    %c0_14 = arith.constant 0 : index
    %c0_15 = arith.constant 0 : index
    %24 = vector.load %arg6[%c0_14, %c0_15] : memref<8x16xf32, #tpu.memory_space<vmem>>, vector<8x16xf32>
    tpu.vector_store %arg6[%c0_14, %c0_15], %23 {strides = array<i32>} : memref<8x16xf32, #tpu.memory_space<vmem>>, vector<8x16xf32>,
    return
  }
  func.func @transform_0(%arg0: i32) -> (i32, i32) {
    %c0_i32 = arith.constant 0 : i32
    %c0_i32_0 = arith.constant 0 : i32
    return %arg0, %c0_i32 : i32, i32
  }
  func.func @transform_1(%arg0: i32) -> (i32, i32) {
    %c0_i32 = arith.constant 0 : i32
    %c0_i32_0 = arith.constant 0 : i32
    %c0_i32_1 = arith.constant 0 : i32
    return %c0_i32, %c0_i32_0 : i32, i32
  }
  func.func @transform_2(%arg0: i32) -> (i32, i32) {
    %c0_i32 = arith.constant 0 : i32
    %c0_i32_0 = arith.constant 0 : i32
    %c0_i32_1 = arith.constant 0 : i32
    return %c0_i32, %c0_i32_0 : i32, i32
  }
  func.func @transform_3(%arg0: i32) -> (i32, i32) {
    %c0_i32 = arith.constant 0 : i32
    %c0_i32_0 = arith.constant 0 : i32
    %c0_i32_1 = arith.constant 0 : i32
    return %c0_i32, %c0_i32_0 : i32, i32
  }
  func.func @transform_4(%arg0: i32) -> (i32, i32) {
    %c0_i32 = arith.constant 0 : i32
    %c0_i32_0 = arith.constant 0 : i32
    %c0_i32_1 = arith.constant 0 : i32
    return %c0_i32, %c0_i32_0 : i32, i32
  }
  func.func @transform_5(%arg0: i32) -> (i32, i32) {
    %c0_i32 = arith.constant 0 : i32
    %c0_i32_0 = arith.constant 0 : i32
    return %arg0, %c0_i32 : i32, i32
  }
}

</mosaic_0001>

<bundles_post_ra>
// kernel: tpu_custom_call.1
= control target key start
LH: loop header
LB: loop body
LE: loop exit
PB: predicated region body
PF: predicated region fallthrough
CT: control target
= control target key end

     0   :  { %10 = vsyncpa [#allocation3], 0  ;;  %vm30_vm0 = vcmask 261120   ;;  %vm87_vm1 = vcmask 130048   ;;  %s240_s0 = inlined_call_operand.vmem [shape: f32[2,32], index: 0, kind: input, shape index: {}]   ;;  %s241_s1 = inlined_call_operand.vmem [shape: f32[32,32], index: 1, kind: input, shape index: {}]   ;;  %s242_s2 = inlined_call_operand.vmem [shape: f32[1,32], index: 2, kind: input, shape index: {}]   ;;  %s243_s3 = inlined_call_operand.vmem [shape: f32[32,16], index: 3, kind: input, shape index: {}]   ;;  %s244_s4 = inlined_call_operand.vmem [shape: f32[1,16], index: 4, kind: input, shape index: {}]   ;;  %s245_s5 = inlined_call_operand.hbm [shape: f32[2,16], index: 5, kind: output, shape index: {}]  }
   0x1   :  { %v25_v0 = vld [vmem:[%s241_s1 + $0x18] sm:$0xff]  ;;  %v24_v1 = vld [vmem:[%s241_s1 + $0x10] sm:$0xff]  ;;  %v23_v2 = vld [vmem:[%s241_s1 + $0x8] sm:$0xff] }
   0x2   :  { %46 = vmatpush.msra.mxu0 %v25_v0  ;;  %v58_v3 = vld [vmem:[%s243_s3 + $0x18] sm:$0xff]  ;;  %v22_v4 = vld [vmem:[%s241_s1] sm:$0xff]  ;;  %v57_v6 = vld [vmem:[%s243_s3 + $0x10] sm:$0xff] }
   0x3   :  { %78 = vmatpush.msra.mxu1 %v58_v3  ;;  %v21_v5 = vld [vmem:[%s240_s0] sm:$0xff]  ;;  %v56_v7 = vld [vmem:[%s243_s3 + $0x8] sm:$0xff] }
   0x4   :  { %47 = vmatpush.msra.mxu0 %v24_v1  ;;  %v55_v8 = vld [vmem:[%s243_s3] sm:$0xff] }
   0x5   :  { %79 = vmatpush.msra.mxu1 %v57_v6  ;;  %v136_v9 = vld [vmem:[%s242_s2] ss:$0 sm:$0xff] }
   0x6   :  { %48 = vmatpush.msra.mxu0 %v23_v2  ;;  %v137_v13 = vld [vmem:[%s244_s4] ss:$0 sm:$0xff] }
   0x7   :  { %80 = vmatpush.msra.mxu1 %v56_v7 }
   0x8   :  { %49 = vmatpush.msra.mxu0 %v22_v4 }
   0x9   :  { %131 = vmatmul.msk.f32.vlgmr.msra.gmra.mxu0 %vm30_vm0, %v21_v5  ;;  %81 = vmatpush.msra.mxu1 %v55_v8 }
  0x86   :  { %v51_v10 = vpop.f32.mrf.mxu0 }
  0x87   :  { %v52_v11 = vadd.f32 %v136_v9, %v51_v10 }
  0x89   :  { %v54_v12 = vmax.f32 %v52_v11, 0.0 }
  0x8b   :  { %132 = vmatmul.msk.f32.vlgmr.msra.gmra.mxu1 %vm30_vm0, %v54_v12 }
 0x108   :  { %v83_v14 = vpop.f32.mrf.mxu1 }
 0x109   :  { %v84_v15 = vadd.f32 %v137_v13, %v83_v14 }
 0x10b   :  { %v86_v16 = vmax.f32 %v84_v15, 0.0 }
 0x10d   :  { %v88_v17 = vsel %vm87_vm1, %v86_v16, -inf }
 0x10e   :  { %89 = vmax.xlane.f32.xlu0 %v88_v17 }
 0x181   :  { %v90_v18 = vpop.xlane.xlu0 %89 }
 0x182   :  { %v91_v19 = vsub.f32 %v86_v16, %v90_v18 }
 0x184   :  { %v92_v20 = vmul.f32 1.442695, %v91_v19 }
 0x186   :  { %138 = vpow2.f32 %v92_v20 }
 0x18c   :  { %v139_v21 = vpop.eup %138 }
 0x18d   :  { %v94_v22 = vsel %vm87_vm1, %v139_v21, 0.0 }
 0x18e   :  { %95 = vadd.xlane.f32.xlu0 %v94_v22 }
 0x201   :  { %v96_v23 = vpop.xlane.xlu0 %95 }
 0x202   :  { %140 = vrcp.f32 %v96_v23  ;;  %v108_v27 = vand.u32 2147483648, %v96_v23  ;;  %v106_v29 = vand.u32 2147483647, %v96_v23  ;;  %vm102_vm3 = vweird.f32 %v96_v23 }
 0x204   :  { %v109_v31 = vor.u32 1.1754944e-38, %v108_v27  ;;  %vm107_vm5 = vcmp.eq.f32.partialorder %v106_v29, 8.507059e+37 }
 0x208   :  { %v141_v24 = vpop.eup %140 }
 0x209   :  { %v98_v25 = vmul.f32 %v141_v24, %v96_v23  ;;  %vm103_vm2 = vweird.f32 %v141_v24 }
 0x20a   :  { %vm104_vm4 = vmor %vm102_vm3, %vm103_vm2 }
 0x20b   :  { %v99_v26 = vsub.f32 1.0, %v98_v25 }
 0x20d   :  { %v100_v28 = vmul.f32 %v141_v24, %v99_v26 }
 0x20f   :  { %v101_v30 = vadd.f32 %v141_v24, %v100_v28 }
 0x211   :  { %v105_v32 = vsel %vm104_vm4, %v141_v24, %v101_v30 }
 0x212   :  { %v110_v33 = vsel %vm107_vm5, %v109_v31, %v105_v32 }
 0x213   :  { %v111_v34 = vmul.f32 %v139_v21, %v110_v33 }
 0x215   :  { %112 = vst.msk [vmem:[#allocation2] sm:$0xff] %vm87_vm1, %v111_v34 }
 0x216   :  { %116 = vsyncadd [#allocation3], 96  ;;  %s119_s4 = sshll.u32 %s245_s5, 4  ;;  %s168_s13 = smov [#allocation2]   ;;  %s120_s4 = int_to_ptr.hbm [resolvable:$true] %s119_s4 }
 0x217   :  { %s117_s14 = sshll.u32 %s168_s13, 4  ;;  %s169_s15 = smov 32   ;;  %s118_s14 = int_to_ptr.vmem [resolvable:$true] %s117_s14 }
 0x218   :  { %s170_s16 = smov 2  }
 0x219   :  { %125 = dma.vmem_to_hbm [thread:$0]  %s118_s14, 32, %s120_s4, [#allocation3], %s169_s15, %s169_s15, %s170_s16  }
 0x21a   :  { %166 = dma.done.wait [#allocation3], 128  }
 0x21b   :  { %167 = vsyncadd [#allocation3], 4294967168 }
 0x21c   :  { %130 = vsyncpa [#allocation3], 1 }

</bundles_post_ra>
